<compile_context>
chip_gen: v6e
topology: v6e:2x2x1
jax: 0.10.0
libtpu: 0.0.40
codegen_flags: <defaults>
</compile_context>

<pallas_src>
import math

import jax
import jax.numpy as jnp
from jax.experimental import pallas as pl
from jax.experimental.pallas import tpu as pltpu


_FALLBACK_VMEM_BYTES = 64 * 1024 * 1024   # assume v7x-sized VMEM if query fails


def _gelu_new(x):
    # GPT-2 "gelu_new": 0.5*x*(1+tanh(sqrt(2/pi)*(x + 0.044715*x^3)))
    c = math.sqrt(2.0 / math.pi)
    return 0.5 * x * (1.0 + jnp.tanh(c * (x + 0.044715 * x * x * x)))


def _make_kernel(has_mask: bool):
    """Builds the kernel; the mask-free variant drops the mask input stream."""

    def body(x_ref, w_ref, mask_ref, rep_ref, scores_ref):
        x = x_ref[...]                                # (TB, S, H), native dtype
        xf = x.astype(jnp.float32)
        w = w_ref[...].astype(jnp.float32)            # (1, 1, H); implicit
                                                      # sublane broadcast, no
                                                      # TB-wide materialization

        # scores = gelu_new(sum_H x*w): VPU mul + lane reduction -> (TB, S).
        raw = jnp.sum(xf * w, axis=-1)
        scores = _gelu_new(raw)
        if mask_ref is not None:
            scores = scores + mask_ref[...].astype(jnp.float32)

        # Numerically-stable softmax over S (lane axis of the (TB, S) block).
        m = jnp.max(scores, axis=-1, keepdims=True)
        e = jnp.exp(scores - m)
        probs = e / jnp.sum(e, axis=-1, keepdims=True)      # (TB, S) f32, exact

        # rep = sum_S probs * x: VPU mul + sublane reduction, f32 accumulate.
        rep = jnp.sum(xf * probs[:, :, None], axis=1)       # (TB, H) f32

        rep_ref[...] = rep.astype(rep_ref.dtype)
        scores_ref[...] = probs.astype(scores_ref.dtype)

    if has_mask:
        def kernel(x_ref, w_ref, mask_ref, rep_ref, scores_ref):
            body(x_ref, w_ref, mask_ref, rep_ref, scores_ref)
    else:
        def kernel(x_ref, w_ref, rep_ref, scores_ref):
            body(x_ref, w_ref, None, rep_ref, scores_ref)
    return kernel


def _vmem_capacity_bytes():
    try:
        return int(pltpu.get_tpu_info().vmem_capacity_bytes)
    except Exception:
        return _FALLBACK_VMEM_BYTES


def _vmem_budget():
    """Returns (vmem_limit_bytes, tile_budget_bytes) for this chip generation."""
    cap = _vmem_capacity_bytes()
    if cap >= 128 * 1024 * 1024:           # v5e / v6e: 128 MiB physical VMEM
        vmem_limit = 112 * 1024 * 1024
        tile_budget = vmem_limit - 16 * 1024 * 1024
    else:                                   # v7x: 64 MiB per TensorCore
        vmem_limit = min(48 * 1024 * 1024, cap * 3 // 4)
        tile_budget = vmem_limit - 8 * 1024 * 1024
    return vmem_limit, tile_budget


def _pick_batch_tile(B, S, H, itemsize, tile_budget_bytes):
    # VMEM bytes per batch row:
    #   x block (double-buffered)      : 2 * S*H*itemsize
    #   f32 in-kernel intermediates    : ~2 * S*H*4  (upcast + product buffer)
    #   mask in + scores out (2x buf)  : 4 * S*itemsize
    #   rep out (2x buf)               : 2 * H*itemsize
    #   gelu/softmax f32 chain         : ~8 * S*4
    per_row = (2 * S * H * itemsize + 2 * S * H * 4
               + 4 * S * itemsize + 2 * H * itemsize + 32 * S)
    tb = int(tile_budget_bytes // max(per_row, 1))
    tb = max(1, min(tb, B))
    if B >= 16:
        # Guarantee >= 2 grid steps so the "parallel" batch axis actually
        # splits across both TensorCores on v7x.
        tb = min(tb, -(-B // 2))
    if tb < B:
        # Keep partial tiles 8-sublane aligned -> dense (TB, S)/(TB, H) stores.
        tb = min(B, max(8, (tb // 8) * 8))
    # TODO(synk): if even TB == 8 exceeds the budget (huge S*H per row), add a
    # second "arbitrary" grid axis over S with online-softmax accumulators.
    return tb


def average_self_attention(inputs, attention_weights, attention_mask=None):
    """inputs: (B, S, H); attention_weights: (H,); attention_mask: optional
    additive mask broadcastable to (B, S).  Returns (rep (B, H), scores (B, S))
    in inputs.dtype, matching the PyTorch module."""
    B, S, H = inputs.shape
    out_dtype = inputs.dtype
    w3 = jnp.asarray(attention_weights).reshape(1, 1, H)

    vmem_limit, tile_budget = _vmem_budget()
    TB = _pick_batch_tile(B, S, H, inputs.dtype.itemsize, tile_budget)

    grid = (pl.cdiv(B, TB),)
    x_spec = pl.BlockSpec((TB, S, H), lambda b: (b, 0, 0))
    w_spec = pl.BlockSpec((1, 1, H), lambda b: (0, 0, 0))
    out_specs = (pl.BlockSpec((TB, H), lambda b: (b, 0)),
                 pl.BlockSpec((TB, S), lambda b: (b, 0)))
    out_shape = (jax.ShapeDtypeStruct((B, H), out_dtype),
                 jax.ShapeDtypeStruct((B, S), out_dtype))
    compiler_params = pltpu.CompilerParams(
        dimension_semantics=("parallel",),   # batch tiles shard across TCs
        vmem_limit_bytes=vmem_limit,
    )

    if attention_mask is not None:
        # Ship the additive mask in the inputs dtype (halves its HBM traffic
        # on bf16 runs); it is upcast to f32 inside the kernel before softmax.
        mask2 = jnp.broadcast_to(jnp.asarray(attention_mask),
                                 (B, S)).astype(inputs.dtype)
        mask_spec = pl.BlockSpec((TB, S), lambda b: (b, 0))
        rep, scores = pl.pallas_call(
            _make_kernel(True),
            out_shape=out_shape,
            grid=grid,
            in_specs=[x_spec, w_spec, mask_spec],
            out_specs=out_specs,
            compiler_params=compiler_params,
        )(inputs, w3, mask2)
    else:
        rep, scores = pl.pallas_call(
            _make_kernel(False),
            out_shape=out_shape,
            grid=grid,
            in_specs=[x_spec, w_spec],
            out_specs=out_specs,
            compiler_params=compiler_params,
        )(inputs, w3)

    return rep, scores


def _reference(inputs, w, mask=None):
    # Pure-JAX reference mirroring the PyTorch forward.
    scores = _gelu_new(jnp.einsum("bsh,h->bs", inputs.astype(jnp.float32),
                                  jnp.asarray(w, jnp.float32)))
    if mask is not None:
        scores = scores + jnp.asarray(mask, jnp.float32)
    scores = jax.nn.softmax(scores, axis=-1)
    rep = jnp.sum(inputs.astype(jnp.float32) * scores[..., None], axis=1)
    return rep.astype(inputs.dtype), scores.astype(inputs.dtype)


if __name__ == "__main__":
    key = jax.random.PRNGKey(0)
    keys = jax.random.split(key, 9)

    def _check(B, S, H, use_mask, kx, kw, km, tol):
        inputs = jax.random.normal(kx, (B, S, H), dtype=jnp.float32)
        w = 0.02 * jax.random.normal(kw, (H,), dtype=jnp.float32)
        mask = None
        if use_mask:
            mask = jnp.where(jax.random.uniform(km, (B, S)) > 0.25,
                             0.0, -1e9).astype(jnp.float32)
        rep, scores = average_self_attention(inputs, w, mask)
        jax.block_until_ready((rep, scores))
        rep_ref, scores_ref = _reference(inputs, w, mask)
        assert rep.shape == (B, H) and scores.shape == (B, S)
        assert jnp.allclose(scores, scores_ref, atol=tol, rtol=tol), "scores mismatch"
        assert jnp.allclose(rep, rep_ref, atol=tol, rtol=tol), "rep mismatch"

    # Small primary shape, with and without the additive mask.
    _check(2, 8, 32, True, keys[0], keys[1], keys[2], tol=1e-3)
    _check(2, 8, 32, False, keys[3], keys[4], keys[5], tol=1e-3)
    # Multi-step grid with a ragged last batch tile (exercises masked stores
    # and the 8-sublane-aligned tiling path).
    _check(20, 128, 256, True, keys[6], keys[7], keys[8], tol=1e-3)

    print("KERNEL_OK")
</pallas_src>

<mosaic_0001>
module attributes {stable_mosaic.version = 11 : i64} {
  func.func @kernel(%arg0: i32, %arg1: memref<2x8x32xf32, #tpu.memory_space<vmem>>, %arg2: memref<1x1x32xf32, #tpu.memory_space<vmem>>, %arg3: memref<2x8xf32, #tpu.memory_space<vmem>>, %arg4: memref<2x32xf32, #tpu.memory_space<vmem>>, %arg5: memref<2x8xf32, #tpu.memory_space<vmem>>) attributes {dimension_semantics = [#tpu.dimension_semantics<parallel>], iteration_bounds = array<i64: 1>, scalar_prefetch = 0 : i64, scratch_operands = 0 : i64, tpu.core_type = #tpu.core_type<tc>, window_params = [{transform_indices = @transform_0, window_bounds = array<i64: 2, 8, 32>}, {pipeline_mode = #tpu.pipeline_mode<synchronous>, transform_indices = @transform_1, window_bounds = array<i64: 1, 1, 32>}, {transform_indices = @transform_2, window_bounds = array<i64: 2, 8>}, {transform_indices = @transform_3, window_bounds = array<i64: 2, 32>}, {transform_indices = @transform_4, window_bounds = array<i64: 2, 8>}]} {
    %c0 = arith.constant 0 : index
    %c0_0 = arith.constant 0 : index
    %c0_1 = arith.constant 0 : index
    %0 = vector.load %arg1[%c0, %c0_0, %c0_1] : memref<2x8x32xf32, #tpu.memory_space<vmem>>, vector<2x8x32xf32>
    %c0_2 = arith.constant 0 : index
    %c0_3 = arith.constant 0 : index
    %c0_4 = arith.constant 0 : index
    %1 = vector.load %arg2[%c0_2, %c0_3, %c0_4] : memref<1x1x32xf32, #tpu.memory_space<vmem>>, vector<1x1x32xf32>
    %2 = vector.broadcast %1 : vector<1x1x32xf32> to vector<2x8x32xf32>
    %3 = arith.mulf %0, %2 : vector<2x8x32xf32>
    %cst = arith.constant dense<0.000000e+00> : vector<2x8xf32>
    %4 = vector.multi_reduction <add>, %3, %cst [2] : vector<2x8x32xf32> to vector<2x8xf32>
    %cst_5 = arith.constant 5.000000e-01 : f32
    %5 = vector.broadcast %cst_5 : f32 to vector<2x8xf32>
    %6 = arith.mulf %5, %4 : vector<2x8xf32>
    %cst_6 = arith.constant 4.471500e-02 : f32
    %7 = vector.broadcast %cst_6 : f32 to vector<2x8xf32>
    %8 = arith.mulf %7, %4 : vector<2x8xf32>
    %9 = arith.mulf %8, %4 : vector<2x8xf32>
    %10 = arith.mulf %9, %4 : vector<2x8xf32>
    %11 = arith.addf %4, %10 : vector<2x8xf32>
    %cst_7 = arith.constant 0.797884583 : f32
    %12 = vector.broadcast %cst_7 : f32 to vector<2x8xf32>
    %13 = arith.mulf %12, %11 : vector<2x8xf32>
    %14 = math.tanh %13 : vector<2x8xf32>
    %cst_8 = arith.constant 1.000000e+00 : f32
    %15 = vector.broadcast %cst_8 : f32 to vector<2x8xf32>
    %16 = arith.addf %15, %14 : vector<2x8xf32>
    %17 = arith.mulf %6, %16 : vector<2x8xf32>
    %c0_9 = arith.constant 0 : index
    %c0_10 = arith.constant 0 : index
    %18 = vector.load %arg3[%c0_9, %c0_10] : memref<2x8xf32, #tpu.memory_space<vmem>>, vector<2x8xf32>
    %19 = arith.addf %17, %18 : vector<2x8xf32>
    %cst_11 = arith.constant dense<0xFF800000> : vector<2xf32>
    %20 = vector.multi_reduction <maximumf>, %19, %cst_11 [1] : vector<2x8xf32> to vector<2xf32>
    %21 = vector.shape_cast %20 : vector<2xf32> to vector<2x1xf32>
    %22 = vector.broadcast %21 : vector<2x1xf32> to vector<2x8xf32>
    %23 = arith.subf %19, %22 : vector<2x8xf32>
    %24 = math.exp %23 : vector<2x8xf32>
    %cst_12 = arith.constant dense<0.000000e+00> : vector<2xf32>
    %25 = vector.multi_reduction <add>, %24, %cst_12 [1] : vector<2x8xf32> to vector<2xf32>
    %26 = vector.shape_cast %25 : vector<2xf32> to vector<2x1xf32>
    %27 = vector.broadcast %26 : vector<2x1xf32> to vector<2x8xf32>
    %28 = arith.divf %24, %27 : vector<2x8xf32>
    %29 = vector.shape_cast %28 : vector<2x8xf32> to vector<2x8x1xf32>
    %30 = vector.broadcast %29 : vector<2x8x1xf32> to vector<2x8x32xf32>
    %31 = arith.mulf %0, %30 : vector<2x8x32xf32>
    %cst_13 = arith.constant dense<0.000000e+00> : vector<2x32xf32>
    %32 = vector.multi_reduction <add>, %31, %cst_13 [1] : vector<2x8x32xf32> to vector<2x32xf32>
    %c0_14 = arith.constant 0 : index
    %c0_15 = arith.constant 0 : index
    %33 = vector.load %arg4[%c0_14, %c0_15] : memref<2x32xf32, #tpu.memory_space<vmem>>, vector<2x32xf32>
    tpu.vector_store %arg4[%c0_14, %c0_15], %32 {strides = array<i32>} : memref<2x32xf32, #tpu.memory_space<vmem>>, vector<2x32xf32>,
    %c0_16 = arith.constant 0 : index
    %c0_17 = arith.constant 0 : index
    %34 = vector.load %arg5[%c0_16, %c0_17] : memref<2x8xf32, #tpu.memory_space<vmem>>, vector<2x8xf32>
    tpu.vector_store %arg5[%c0_16, %c0_17], %28 {strides = array<i32>} : memref<2x8xf32, #tpu.memory_space<vmem>>, vector<2x8xf32>,
    return
  }
  func.func @transform_0(%arg0: i32) -> (i32, i32, i32) {
    %c0_i32 = arith.constant 0 : i32
    %c0_i32_0 = arith.constant 0 : i32
    %c0_i32_1 = arith.constant 0 : i32
    return %arg0, %c0_i32, %c0_i32_0 : i32, i32, i32
  }
  func.func @transform_1(%arg0: i32) -> (i32, i32, i32) {
    %c0_i32 = arith.constant 0 : i32
    %c0_i32_0 = arith.constant 0 : i32
    %c0_i32_1 = arith.constant 0 : i32
    %c0_i32_2 = arith.constant 0 : i32
    return %c0_i32, %c0_i32_0, %c0_i32_1 : i32, i32, i32
  }
  func.func @transform_2(%arg0: i32) -> (i32, i32) {
    %c0_i32 = arith.constant 0 : i32
    %c0_i32_0 = arith.constant 0 : i32
    return %arg0, %c0_i32 : i32, i32
  }
  func.func @transform_3(%arg0: i32) -> (i32, i32) {
    %c0_i32 = arith.constant 0 : i32
    %c0_i32_0 = arith.constant 0 : i32
    return %arg0, %c0_i32 : i32, i32
  }
  func.func @transform_4(%arg0: i32) -> (i32, i32) {
    %c0_i32 = arith.constant 0 : i32
    %c0_i32_0 = arith.constant 0 : i32
    return %arg0, %c0_i32 : i32, i32
  }
}

</mosaic_0001>

<bundles_post_ra>
// kernel: tpu_custom_call.1
= control target key start
LH: loop header
LB: loop body
LE: loop exit
PB: predicated region body
PF: predicated region fallthrough
CT: control target
= control target key end

     0   :  { %10 = vsyncpa [#allocation3], 0  ;;  %s408_s0 = inlined_call_operand.hbm [shape: f32[2,8,32], index: 0, kind: input, shape index: {}]   ;;  %s409_s1 = inlined_call_operand.vmem [shape: f32[1,1,32], index: 1, kind: input, shape index: {}]   ;;  %s410_s2 = inlined_call_operand.vmem [shape: f32[2,8], index: 2, kind: input, shape index: {}]   ;;  %s411_s3 = inlined_call_operand.hbm [shape: f32[2,32], index: 3, kind: output, shape index: {0}]   ;;  %s412_s4 = inlined_call_operand.hbm [shape: f32[2,8], index: 4, kind: output, shape index: {1}]  }
   0x1   :  { %11 = vsyncpa [#allocation4], 0 }
   0x2   :  { %12 = vsyncpa [#allocation7], 0  ;;  %s325_s15 = smov [#allocation2]  }
   0x3   :  { %s18_s16 = sshll.u32 %s325_s15, 4  ;;  %s19_s16 = int_to_ptr.vmem [resolvable:$true] %s18_s16 }
   0x4   :  { %s267_s17 = scalar_lea.vmem %s19_s16, 256  ;;  %p272_p1 = scmp.lt.s32.totalorder %s19_s16, %s19_s16 }
   0x5   :  { %p268_p0 = scmp.ne.s32.totalorder %s19_s16, %s267_s17  ;;  %p273_p2 = scmp.lt.s32.totalorder %s267_s17, %s267_s17 }
   0x7   :  { %p274_p3 = por %p273_p2, %p272_p1 }
   0x9   :  { %p275_p4 = pnand %p274_p3, %p268_p0 }
   0xb   :  { %278 = shalt.err (!%p275_p4)
}
   0xc   :  { %s326_s18 = smov 128   ;;  %s327_s19 = smov 8  }
   0xd   :  { %24 = dma.hbm_to_vmem [thread:$0]  %s408_s0, 256, %s19_s16, [#allocation3], %s326_s18, %s326_s18, %s327_s19  }
   0xe   :  { %319 = dma.done.wait [#allocation3], 256  }
   0xf   :  { %320 = vsyncadd [#allocation3], 4294967040  ;;  %v70_v0 = vlaneseq  ;;  %v363_v5 = vld [vmem:[#allocation2] sm:$0xff]  ;;  %vm43_vm0 = vcmask 261120   ;;  %v368_v7 = vld [vmem:[#allocation2 + $0x8] sm:$0xff]  ;;  %v328_v16 = vmov 0  }
  0x10   :  { %v238_v6 = vld [vmem:[%s409_s1] ss:$0 sm:$0xff]  ;;  %245 = vset.pattern.permute.xlu0 %v328_v16  ;;  %246 = vset.pattern.permute.xlu1 %v328_v16  ;;  %vm106_vm1 = vcmask 1041409   ;;  %vm109_vm2 = vcmask 58368   ;;  %s329_s1 = smov [#allocation6]  }
  0x11   :  { %v71_v1 = vshrl.u32 %v70_v0, 7  ;;  %v97_v2 = vand.u32 127, %v70_v0  ;;  %v41_v9 = vmul.f32 %v238_v6, %v363_v5  ;;  %v42_v10 = vmul.f32 %v238_v6, %v368_v7  ;;  %v68_v11 = vld [vmem:[%s410_s2] sm:$0x3]  ;;  %s225_s2 = sshll.u32 %s329_s1, 4  ;;  %s226_s2 = int_to_ptr.vmem [resolvable:$true] %s225_s2 }
  0x12   :  { %s279_s25 = scalar_lea.vmem %s226_s2, 32  ;;  %p284_p6 = scmp.lt.s32.totalorder %s226_s2, %s226_s2 }
  0x13   :  { %v359_v3 = vsub.s32 %v97_v2, %v71_v1  ;;  %v361_v4 = vsub.s32 0, %v71_v1  ;;  %v370_v8 = vsub.s32 1, %v71_v1  ;;  %v44_v13 = vsel %vm43_vm0, %v41_v9, 0.0  ;;  %p280_p5 = scmp.ne.s32.totalorder %s226_s2, %s279_s25  ;;  %p285_p7 = scmp.lt.s32.totalorder %s279_s25, %s279_s25 }
  0x14   :  { %45 = vadd.xlane.f32.xlu0 %v44_v13  ;;  %v47_v15 = vsel %vm43_vm0, %v42_v10, 0.0 }
  0x15   :  { %v73_v12 = vrot.slane %v68_v11, %v361_v4  ;;  %v80_v14 = vrot.slane %v68_v11, %v370_v8  ;;  %p286_p8 = por %p285_p7, %p284_p6 }
  0x17   :  { %75 = vbcast.lane.b32.xlu1 %v73_v12, 256  ;;  %p287_p9 = pnand %p286_p8, %p280_p5 }
  0x18   :  { %48 = vadd.xlane.f32.xlu0 %v47_v15 }
  0x1b   :  { %82 = vbcast.lane.b32.xlu1 %v80_v14, 256 }
  0x89   :  { %v76_v30 = vpop.permute.xlu1 %75 }
  0x8d   :  { %v83_v38 = vpop.permute.xlu1 %82 }
  0x9d   :  { %v46_v17 = vpop.xlane.xlu0 %45 }
  0x9e   :  { %v52_v18 = vmul.f32 0.044715, %v46_v17  ;;  %v50_v31 = vmul.f32 0.5, %v46_v17 }
  0xa0   :  { %v54_v19 = vmul.f32 %v52_v18, %v46_v17 }
  0xa1   :  { %v49_v20 = vpop.xlane.xlu0 %48 }
  0xa2   :  { %v56_v21 = vmul.f32 %v54_v19, %v46_v17  ;;  %v53_v22 = vmul.f32 0.044715, %v49_v20  ;;  %v51_v36 = vmul.f32 0.5, %v49_v20 }
  0xa4   :  { %v58_v23 = vadd.f32 %v56_v21, %v46_v17  ;;  %v55_v24 = vmul.f32 %v53_v22, %v49_v20 }
  0xa6   :  { %v57_v25 = vmul.f32 %v55_v24, %v49_v20  ;;  %v60_v26 = vmul.f32 0.7978846, %v58_v23 }
  0xa8   :  { %v59_v27 = vadd.f32 %v57_v25, %v49_v20  ;;  %247 = vtanh.f32 %v60_v26 }
  0xaa   :  { %v61_v28 = vmul.f32 0.7978846, %v59_v27 }
  0xac   :  { %249 = vtanh.f32 %v61_v28 }
  0xb5   :  { %v248_v29 = vpop.eup %247 }
  0xb6   :  { %v64_v32 = vadd.f32 1.0, %v248_v29 }
  0xb8   :  { %v66_v33 = vmul.f32 %v64_v32, %v50_v31 }
  0xb9   :  { %v250_v34 = vpop.eup %249 }
  0xba   :  { %v86_v35 = vadd.f32 %v76_v30, %v66_v33  ;;  %v65_v37 = vadd.f32 1.0, %v250_v34 }
  0xbc   :  { %91 = vperm.xlu0 %245, %v86_v35   ;;  %v67_v39 = vmul.f32 %v65_v37, %v51_v36 }
  0xbe   :  { %v87_v40 = vadd.f32 %v83_v38, %v67_v39 }
  0xc0   :  { %94 = vperm.xlu1 %246, %v87_v40  }
 0x137   :  { %v92_v41 = vpop.permute.xlu0 %91 }
 0x138   :  { %v101_v43 = vrot.slane %v92_v41, %v359_v3 }
 0x13b   :  { %v95_v42 = vpop.permute.xlu1 %94 }
 0x13c   :  { %v105_v44 = vrot.slane %v95_v42, %v359_v3 }
 0x13e   :  { %v107_v45 = vsel %vm106_vm1, %v105_v44, %v101_v43 }
 0x13f   :  { %v110_v46 = vsel %vm109_vm2, %v107_v45, -inf }
 0x140   :  { %111 = vmax.xlane.f32.xlu1 %v110_v46 }
 0x1c9   :  { %v112_v47 = vpop.xlane.xlu1 %111 }
 0x1ca   :  { %v117_v48 = vrot.slane %v112_v47, %v361_v4  ;;  %v121_v49 = vrot.slane %v112_v47, %v370_v8 }
 0x1cc   :  { %v124_v50 = vsub.f32 %v86_v35, %v117_v48  ;;  %v125_v51 = vsub.f32 %v87_v40, %v121_v49 }
 0x1ce   :  { %v126_v52 = vmul.f32 1.442695, %v124_v50  ;;  %v128_v53 = vmul.f32 1.442695, %v125_v51 }
 0x1d0   :  { %251 = vpow2.f32 %v126_v52 }
 0x1d1   :  { %253 = vpow2.f32 %v128_v53 }
 0x1dd   :  { %v252_v54 = vpop.eup %251 }
 0x1de   :  { %v254_v55 = vpop.eup %253  ;;  %133 = vperm.xlu1 %246, %v252_v54  }
 0x1df   :  { %136 = vperm.xlu0 %245, %v254_v55  }
 0x259   :  { %v134_v56 = vpop.permute.xlu1 %133 }
 0x25a   :  { %v137_v57 = vpop.permute.xlu0 %136  ;;  %v141_v58 = vrot.slane %v134_v56, %v359_v3 }
 0x25b   :  { %v145_v59 = vrot.slane %v137_v57, %v359_v3 }
 0x25d   :  { %v146_v60 = vsel %vm106_vm1, %v145_v59, %v141_v58 }
 0x25e   :  { %v148_v61 = vsel %vm109_vm2, %v146_v60, 0.0 }
 0x25f   :  { %149 = vadd.xlane.f32.xlu0 %v148_v61 }
 0x2e8   :  { %v150_v62 = vpop.xlane.xlu0 %149 }
 0x2e9   :  { %v155_v63 = vrot.slane %v150_v62, %v361_v4  ;;  %v159_v0 = vrot.slane %v150_v62, %v370_v8 }
 0x2eb   :  { %255 = vrcp.f32 %v155_v63 }
 0x2ec   :  { %257 = vrcp.f32 %v159_v0 }
 0x2f8   :  { %v256_v1 = vpop.eup %255 }
 0x2f9   :  { %v163_v2 = vmul.f32 %v256_v1, %v252_v54  ;;  %v258_v6 = vpop.eup %257 }
 0x2fa   :  { %v165_v9 = vmul.f32 %v258_v6, %v254_v55 }
 0x2fb   :  { %168 = vperm.xlu1 %246, %v163_v2  }
 0x2ff   :  { %173 = vperm.xlu1 %246, %v165_v9  }
 0x376   :  { %v169_v10 = vpop.permute.xlu1 %168 }
 0x377   :  { %v176_v11 = vmul.f32 %v169_v10, %v363_v5  ;;  %v201_v4 = vrot.slane %v169_v10, %v359_v3 }
 0x379   :  { %v178_v12 = vsel %vm43_vm0, %v176_v11, 0.0 }
 0x37a   :  { %v179_v13 = vrot.slane %v178_v12, 4  ;;  %v174_v14 = vpop.permute.xlu1 %173 }
 0x37b   :  { %v177_v8 = vmul.f32 %v174_v14, %v368_v7  ;;  %v205_v15 = vrot.slane %v174_v14, %v359_v3 }
 0x37c   :  { %v180_v16 = vadd.f32 %v179_v13, %v178_v12 }
 0x37d   :  { %v185_v17 = vsel %vm43_vm0, %v177_v8, 0.0  ;;  %v206_v18 = vsel %vm106_vm1, %v205_v15, %v201_v4 }
 0x37e   :  { %v181_v19 = vrot.slane %v180_v16, 2  ;;  %v186_v5 = vrot.slane %v185_v17, 4  ;;  %208 = vst.msk [vmem:[#allocation6] sm:$0x3] %vm109_vm2, %v206_v18 }
 0x37f   :  { %290 = shalt.err (!%p287_p9)
}
 0x380   :  { %228 = dma.vmem_to_hbm [thread:$0]  %s226_s2, 32, %s412_s4, [#allocation7]   ;;  %v182_v3 = vadd.f32 %v181_v19, %v180_v16  ;;  %v187_v7 = vadd.f32 %v186_v5, %v185_v17  ;;  %vm196_vm3 = vcmask 254976  }
 0x381   :  { %s330_s28 = smov [#allocation5]  }
 0x382   :  { %v188_v20 = vrot.slane %v187_v7, 2  ;;  %v183_v21 = vrot.slane %v182_v3, 1  ;;  %s215_s29 = sshll.u32 %s330_s28, 4  ;;  %s216_s29 = int_to_ptr.vmem [resolvable:$true] %s215_s29 }
 0x383   :  { %s299_s30 = scalar_lea.vmem %s216_s29, 32  ;;  %p304_p11 = scmp.lt.s32.totalorder %s216_s29, %s216_s29 }
 0x384   :  { %v189_v22 = vadd.f32 %v188_v20, %v187_v7  ;;  %v184_v25 = vadd.f32 %v183_v21, %v182_v3  ;;  %p300_p10 = scmp.ne.s32.totalorder %s216_s29, %s299_s30  ;;  %p305_p12 = scmp.lt.s32.totalorder %s299_s30, %s299_s30 }
 0x386   :  { %v190_v23 = vrot.slane %v189_v22, 1  ;;  %p306_p13 = por %p305_p12, %p304_p11 }
 0x388   :  { %v191_v24 = vadd.f32 %v190_v23, %v189_v22  ;;  %p307_p0 = pnand %p306_p13, %p300_p10 }
 0x38a   :  { %v194_v26 = vsel %vm106_vm1, %v191_v24, %v184_v25 }
 0x38b   :  { %197 = vst.msk [vmem:[#allocation5] sm:$0x3] %vm196_vm3, %v194_v26 }
 0x38c   :  { %310 = shalt.err (!%p307_p0)
}
 0x38d   :  { %218 = dma.vmem_to_hbm [thread:$0]  %s216_s29, 32, %s411_s3, [#allocation4]  }
 0x38e   :  { %321 = dma.done.wait [#allocation4], 32  }
 0x38f   :  { %322 = vsyncadd [#allocation4], 4294967264 }
 0x390   :  { %323 = dma.done.wait [#allocation7], 32  }
 0x391   :  { %324 = vsyncadd [#allocation7], 4294967264 }
 0x392   :  { %235 = vsyncpa [#allocation3], 1 }
 0x393   :  { %236 = vsyncpa [#allocation4], 1 }
 0x394   :  { %237 = vsyncpa [#allocation7], 1 }

</bundles_post_ra>
